<compile_context>
chip_gen: v7x
topology: tpu7x:2x2x1
jax: 0.10.0
libtpu: 0.0.40
codegen_flags: <defaults>
</compile_context>

<pallas_src>
import jax
import jax.numpy as jnp
from jax.experimental import pallas as pl
from jax.experimental.pallas import tpu as pltpu

LANE = 128
SUBLANE = 8
VMEM_BUDGET = 40 * 1024 * 1024   # per-kernel working-set target (fits v7x 64 MiB)
VMEM_LIMIT = 48 * 1024 * 1024    # explicit scoped VMEM limit


def _round_up(x, m):
    return ((x + m - 1) // m) * m


def _cdiv(a, b):
    return (a + b - 1) // b


def lora_kernel(x_ref, at_ref, bt_ref, o_ref, acc_ref):
    # x_ref:   (tm, K)         full-K strip of x rows (loop-invariant in j)
    # at_ref:  (K, rank_pad)   whole A^T, VMEM-resident
    # bt_ref:  (rank_pad, tn)  N-tile of B^T
    # o_ref:   (tm, tn)        output tile
    # acc_ref: (tm, rank_pad)  f32 intermediate t = x @ A^T, computed once per M tile
    j = pl.program_id(1)

    @pl.when(j == 0)
    def _():
        acc_ref[...] = jnp.dot(
            x_ref[...], at_ref[...], preferred_element_type=jnp.float32
        )

    y = jnp.dot(
        acc_ref[...].astype(bt_ref.dtype),
        bt_ref[...],
        preferred_element_type=jnp.float32,
    )
    o_ref[...] = y.astype(o_ref.dtype)


def memory_efficient_lora(x, lora_a, lora_b, *, tm=256, tn=512):
    """x: (..., in_dim); lora_a: (rank, in_dim); lora_b: (out_dim, rank)."""
    rank, in_dim = lora_a.shape
    out_dim, rank_b = lora_b.shape
    assert rank == rank_b

    lead_shape = x.shape[:-1]
    x2 = x.reshape(-1, in_dim)
    M = x2.shape[0]
    dtype = x.dtype
    itemsize = jnp.dtype(dtype).itemsize

    # Pad rank to a full lane width so every layout is lane-dense.
    rank_pad = _round_up(rank, LANE)

    # Weights: one-time transpose, cast to activation dtype, zero-pad rank.
    a_t = lora_a.T.astype(dtype)                                    # (in_dim, rank)
    b_t = lora_b.T.astype(dtype)                                    # (rank, out_dim)
    a_t = jnp.pad(a_t, ((0, 0), (0, rank_pad - rank)))              # (in_dim, rank_pad)
    b_t = jnp.pad(b_t, ((0, rank_pad - rank), (0, 0)))              # (rank_pad, out_dim)

    # out_dim padded to a multiple of 128 -> unmasked lane-dense stores.
    n128 = _round_up(out_dim, LANE)
    tn_eff = min(tn, n128)
    N_pad = _round_up(n128, tn_eff)
    if N_pad != out_dim:
        b_t = jnp.pad(b_t, ((0, 0), (0, N_pad - out_dim)))

    # M tile: load-balance across tiles (<1 tile of padding slack).
    tm_eff = min(tm, _round_up(_cdiv(M, _cdiv(M, tm)), SUBLANE))

    # Shrink tm if the full-K x strip would blow the VMEM budget.
    def _footprint(t):
        return (2 * t * in_dim * itemsize            # x strip (double-buffered)
                + 2 * in_dim * rank_pad * itemsize   # A^T (resident; counted x2)
                + 2 * rank_pad * tn_eff * itemsize   # B^T tile
                + 2 * t * tn_eff * itemsize          # output tile
                + t * rank_pad * 4)                  # f32 acc scratch

    while tm_eff > SUBLANE and _footprint(tm_eff) > VMEM_BUDGET:
        tm_eff = max(SUBLANE, _round_up(tm_eff // 2, SUBLANE))
    # TODO(synk): for extremely large in_dim (footprint(8) > budget), chunk K
    # with a nested pipeline inside the j == 0 branch instead of a full-K strip.

    M_pad = _round_up(M, tm_eff)
    if M_pad != M:
        x2 = jnp.pad(x2, ((0, M_pad - M), (0, 0)))   # only pads rows, never K

    grid = (M_pad // tm_eff, N_pad // tn_eff)

    cost = pl.CostEstimate(
        flops=2 * M * rank_pad * (in_dim + N_pad),
        transcendentals=0,
        bytes_accessed=(M_pad * in_dim + in_dim * rank_pad
                        + rank_pad * N_pad + M_pad * N_pad) * itemsize,
    )

    out = pl.pallas_call(
        lora_kernel,
        out_shape=jax.ShapeDtypeStruct((M_pad, N_pad), dtype),
        grid_spec=pltpu.PrefetchScalarGridSpec(
            num_scalar_prefetch=0,
            grid=grid,
            in_specs=[
                # x: full-K strip, loop-invariant in j -> DMA'd once per M tile.
                pl.BlockSpec((tm_eff, in_dim), lambda i, j: (i, 0)),
                # A^T: whole (in_dim, rank_pad) weight, VMEM-resident.
                pl.BlockSpec((in_dim, rank_pad), lambda i, j: (0, 0)),
                # B^T: N-tile.
                pl.BlockSpec((rank_pad, tn_eff), lambda i, j: (0, j)),
            ],
            out_specs=pl.BlockSpec((tm_eff, tn_eff), lambda i, j: (i, j)),
            scratch_shapes=[pltpu.VMEM((tm_eff, rank_pad), jnp.float32)],
        ),
        compiler_params=pltpu.CompilerParams(
            # j carries the acc scratch (written at j == 0) -> "arbitrary";
            # i is independent -> megacore-shardable on v7x.
            dimension_semantics=("parallel", "arbitrary"),
            vmem_limit_bytes=VMEM_LIMIT,
        ),
        cost_estimate=cost,
    )(x2, a_t, b_t)

    out = out[:M, :out_dim]
    return out.reshape(*lead_shape, out_dim)


if __name__ == "__main__":
    key = jax.random.PRNGKey(0)
    kx, ka, kb, kx2, ka2, kb2 = jax.random.split(key, 6)

    # Case 1: small single-tile shapes (module-style).
    batch, seq, in_dim, out_dim, rank = 2, 8, 32, 32, 4
    x = jax.random.normal(kx, (batch, seq, in_dim), dtype=jnp.float32)
    # Module inits lora_a ~ N(0, 0.02) and leaves lora_b at zeros; use a
    # nonzero lora_b so the kernel's hot path is actually exercised.
    lora_a = 0.02 * jax.random.normal(ka, (rank, in_dim), dtype=jnp.float32)
    lora_b = 0.02 * jax.random.normal(kb, (out_dim, rank), dtype=jnp.float32)

    y = jax.block_until_ready(memory_efficient_lora(x, lora_a, lora_b))
    y_ref = x @ lora_a.T @ lora_b.T
    assert y.shape == (batch, seq, out_dim)
    assert jnp.allclose(y, y_ref, atol=1e-5, rtol=1e-4)

    # Case 2: ragged multi-tile shapes — exercises M padding, multiple M and N
    # tiles, out_dim padding, and the j > 0 acc-reuse path.
    batch2, seq2, in2, out2, rank2 = 2, 10, 96, 200, 4
    x_2 = jax.random.normal(kx2, (batch2, seq2, in2), dtype=jnp.float32)
    la2 = 0.02 * jax.random.normal(ka2, (rank2, in2), dtype=jnp.float32)
    lb2 = 0.02 * jax.random.normal(kb2, (out2, rank2), dtype=jnp.float32)

    y2 = jax.block_until_ready(
        memory_efficient_lora(x_2, la2, lb2, tm=8, tn=128))
    y2_ref = x_2 @ la2.T @ lb2.T
    assert y2.shape == (batch2, seq2, out2)
    assert jnp.allclose(y2, y2_ref, atol=1e-5, rtol=1e-4)

    print("KERNEL_OK")
</pallas_src>

<mosaic_0001>
module attributes {stable_mosaic.version = 11 : i64} {
  func.func @lora_kernel(%arg0: i32, %arg1: i32, %arg2: memref<16x32xf32, #tpu.memory_space<vmem>>, %arg3: memref<32x128xf32, #tpu.memory_space<vmem>>, %arg4: memref<128x128xf32, #tpu.memory_space<vmem>>, %arg5: memref<16x128xf32, #tpu.memory_space<vmem>>, %arg6: memref<16x128xf32, #tpu.memory_space<vmem>>) attributes {dimension_semantics = [#tpu.dimension_semantics<parallel>, #tpu.dimension_semantics<arbitrary>], iteration_bounds = array<i64: 1, 1>, scalar_prefetch = 0 : i64, scratch_operands = 1 : i64, tpu.core_type = #tpu.core_type<tc>, window_params = [{transform_indices = @transform_0, window_bounds = array<i64: 16, 32>}, {pipeline_mode = #tpu.pipeline_mode<synchronous>, transform_indices = @transform_1, window_bounds = array<i64: 32, 128>}, {transform_indices = @transform_2, window_bounds = array<i64: 128, 128>}, {transform_indices = @transform_3, window_bounds = array<i64: 16, 128>}]} {
    %c0_i32 = arith.constant 0 : i32
    %0 = arith.cmpi eq, %arg1, %c0_i32 : i32
    %1 = arith.extui %0 : i1 to i32
    %c0_i32_0 = arith.constant 0 : i32
    %2 = arith.cmpi ne, %1, %c0_i32_0 : i32
    scf.if %2 {
      %c0_6 = arith.constant 0 : index
      %c0_7 = arith.constant 0 : index
      %7 = vector.load %arg2[%c0_6, %c0_7] : memref<16x32xf32, #tpu.memory_space<vmem>>, vector<16x32xf32>
      %c0_8 = arith.constant 0 : index
      %c0_9 = arith.constant 0 : index
      %8 = vector.load %arg3[%c0_8, %c0_9] : memref<32x128xf32, #tpu.memory_space<vmem>>, vector<32x128xf32>
      %cst_10 = arith.constant dense<0.000000e+00> : vector<16x128xf32>
      %9 = tpu.matmul %7, %8, %cst_10 {dimension_numbers = #tpu.dot_dimension_numbers<[1], [0], [0], [1], [0, 0, 1, 1], [], []>} : vector<16x32xf32>, vector<32x128xf32>, vector<16x128xf32> -> vector<16x128xf32>
      %c0_11 = arith.constant 0 : index
      %c0_12 = arith.constant 0 : index
      %10 = vector.load %arg6[%c0_11, %c0_12] : memref<16x128xf32, #tpu.memory_space<vmem>>, vector<16x128xf32>
      tpu.vector_store %arg6[%c0_11, %c0_12], %9 {strides = array<i32>} : memref<16x128xf32, #tpu.memory_space<vmem>>, vector<16x128xf32>,
    } else {
    }
    %c0 = arith.constant 0 : index
    %c0_1 = arith.constant 0 : index
    %3 = vector.load %arg6[%c0, %c0_1] : memref<16x128xf32, #tpu.memory_space<vmem>>, vector<16x128xf32>
    %c0_2 = arith.constant 0 : index
    %c0_3 = arith.constant 0 : index
    %4 = vector.load %arg4[%c0_2, %c0_3] : memref<128x128xf32, #tpu.memory_space<vmem>>, vector<128x128xf32>
    %cst = arith.constant dense<0.000000e+00> : vector<16x128xf32>
    %5 = tpu.matmul %3, %4, %cst {dimension_numbers = #tpu.dot_dimension_numbers<[1], [0], [0], [1], [0, 0, 1, 1], [], []>} : vector<16x128xf32>, vector<128x128xf32>, vector<16x128xf32> -> vector<16x128xf32>
    %c0_4 = arith.constant 0 : index
    %c0_5 = arith.constant 0 : index
    %6 = vector.load %arg5[%c0_4, %c0_5] : memref<16x128xf32, #tpu.memory_space<vmem>>, vector<16x128xf32>
    tpu.vector_store %arg5[%c0_4, %c0_5], %5 {strides = array<i32>} : memref<16x128xf32, #tpu.memory_space<vmem>>, vector<16x128xf32>,
    return
  }
  func.func @transform_0(%arg0: i32, %arg1: i32) -> (i32, i32) {
    %c0_i32 = arith.constant 0 : i32
    %c0_i32_0 = arith.constant 0 : i32
    return %arg0, %c0_i32 : i32, i32
  }
  func.func @transform_1(%arg0: i32, %arg1: i32) -> (i32, i32) {
    %c0_i32 = arith.constant 0 : i32
    %c0_i32_0 = arith.constant 0 : i32
    %c0_i32_1 = arith.constant 0 : i32
    return %c0_i32, %c0_i32_0 : i32, i32
  }
  func.func @transform_2(%arg0: i32, %arg1: i32) -> (i32, i32) {
    %c0_i32 = arith.constant 0 : i32
    %c0_i32_0 = arith.constant 0 : i32
    return %c0_i32, %arg1 : i32, i32
  }
  func.func @transform_3(%arg0: i32, %arg1: i32) -> (i32, i32) {
    %c0_i32 = arith.constant 0 : i32
    return %arg0, %arg1 : i32, i32
  }
}

</mosaic_0001>

<bundles_post_ra>
// kernel: tpu_custom_call.1
= control target key start
LH: loop header
LB: loop body
LE: loop exit
PB: predicated region body
PF: predicated region fallthrough
CT: control target
= control target key end

     0   :  { %8 = vsyncpa [#allocation4], 0  ;;  %s570_s0 = inlined_call_operand.hbm [shape: f32[16,32], index: 0, kind: input, shape index: {}]   ;;  %s571_s1 = inlined_call_operand.hbm [shape: f32[32,128], index: 1, kind: input, shape index: {}]   ;;  %s572_s2 = inlined_call_operand.hbm [shape: f32[128,128], index: 2, kind: input, shape index: {}]   ;;  %s573_s3 = inlined_call_operand.hbm [shape: f32[16,128], index: 3, kind: output, shape index: {}]  }
   0x1   :  { %9 = vsyncpa [#allocation7], 0 }
   0x2   :  { %10 = vsyncpa [#allocation5], 0  ;;  %s475_s12 = smov [#allocation6]   ;;  %s476_s14 = smov [#allocation3]  }
   0x3   :  { %s28_s13 = sshll.u32 %s475_s12, 4  ;;  %s16_s15 = sshll.u32 %s476_s14, 4  ;;  %s29_s13 = int_to_ptr.vmem [resolvable:$true] %s28_s13  ;;  %s501_s15 = int_to_ptr.vmem [resolvable:$true] %s16_s15 }
   0x4   :  { %s381_s18 = scalar_lea.hbm %s571_s1, 512 }
   0x5   :  { %p382_p0 = scmp.ne.s32.totalorder %s571_s1, %s381_s18  ;;  %p385_p1 = scmp.lt.u32.totalorder %s381_s18, %s571_s1 }
   0x7   :  { %p387_p2 = pnand %p385_p1, %p382_p0 }
   0x9   :  { %390 = shalt.err (!%p387_p2)
}
   0xa   :  { %s391_s23 = scalar_lea.vmem %s29_s13, 512  ;;  %p396_p4 = scmp.lt.s32.totalorder %s29_s13, %s29_s13 }
   0xb   :  { %p392_p3 = scmp.ne.s32.totalorder %s29_s13, %s391_s23  ;;  %p397_p5 = scmp.lt.s32.totalorder %s391_s23, %s391_s23 }
   0xd   :  { %p398_p6 = por %p397_p5, %p396_p4 }
   0xf   :  { %p399_p7 = pnand %p398_p6, %p392_p3 }
  0x11   :  { %402 = shalt.err (!%p399_p7)
}
  0x12   :  { %s477_s24 = smov 128   ;;  %s478_s25 = smov 8  }
  0x13   :  { %34 = dma.hbm_to_vmem [thread:$0]  %s571_s1, 512, %s29_s13, [#allocation7], %s477_s24, %s477_s24, %s478_s25  }
  0x14   :  { %s403_s30 = scalar_lea.hbm %s570_s0, 256 }
  0x15   :  { %p404_p8 = scmp.ne.s32.totalorder %s570_s0, %s403_s30  ;;  %p407_p9 = scmp.lt.u32.totalorder %s403_s30, %s570_s0 }
  0x17   :  { %p409_p10 = pnand %p407_p9, %p404_p8 }
  0x19   :  { %412 = shalt.err (!%p409_p10)
}
  0x1a   :  { %s413_s8 = scalar_lea.vmem %s501_s15, 256  ;;  %p418_p12 = scmp.lt.s32.totalorder %s501_s15, %s501_s15 }
  0x1b   :  { %p414_p11 = scmp.ne.s32.totalorder %s501_s15, %s413_s8  ;;  %p419_p13 = scmp.lt.s32.totalorder %s413_s8, %s413_s8 }
  0x1d   :  { %p420_p0 = por %p419_p13, %p418_p12 }
  0x1f   :  { %p421_p1 = pnand %p420_p0, %p414_p11 }
  0x21   :  { %424 = shalt.err (!%p421_p1)
}
  0x22   :  { %22 = dma.hbm_to_vmem [thread:$0]  %s570_s0, 256, %s501_s15, [#allocation4], %s477_s24, %s477_s24, %s478_s25  }
  0x23   :  { %s479_s10 = smov [#allocation8]   ;;  %s425_s14 = scalar_lea.hbm %s572_s2, 2048 }
  0x24   :  { %s40_s11 = sshll.u32 %s479_s10, 4  ;;  %p426_p2 = scmp.ne.s32.totalorder %s572_s2, %s425_s14  ;;  %s41_s11 = int_to_ptr.vmem [resolvable:$true] %s40_s11 }
  0x25   :  { %p429_p3 = scmp.lt.u32.totalorder %s425_s14, %s572_s2 }
  0x27   :  { %p431_p4 = pnand %p429_p3, %p426_p2 }
  0x29   :  { %434 = shalt.err (!%p431_p4)
}
  0x2a   :  { %s435_s20 = scalar_lea.vmem %s41_s11, 2048  ;;  %p440_p6 = scmp.lt.s32.totalorder %s41_s11, %s41_s11 }
  0x2b   :  { %p436_p5 = scmp.ne.s32.totalorder %s41_s11, %s435_s20  ;;  %p441_p7 = scmp.lt.s32.totalorder %s435_s20, %s435_s20 }
  0x2d   :  { %p442_p8 = por %p441_p7, %p440_p6 }
  0x2f   :  { %p443_p9 = pnand %p442_p8, %p436_p5 }
  0x31   :  { %446 = shalt.err (!%p443_p9)
}
  0x32   :  { %46 = dma.hbm_to_vmem [thread:$0]  %s572_s2, 2048, %s41_s11, [#allocation7], %s477_s24, %s477_s24, %s478_s25  }
  0x33   :  { %469 = dma.done.wait [#allocation4], 256  }
  0x34   :  { %470 = vsyncadd [#allocation4], 4294967040 }
  0x35   :  { %471 = dma.done.wait [#allocation7], 2560  }
  0x36   :  { %472 = vsyncadd [#allocation7], 4294964736  ;;  %vm66_vm0 = vcmask 261120   ;;  %v62_v0 = vld [vmem:[#allocation6] sm:$0xff]  ;;  %v63_v1 = vld [vmem:[#allocation6 + $0x8] sm:$0xff]  ;;  %s480_s2 = smov [#allocation9]  }
  0x37   :  { %v64_v2 = vld [vmem:[#allocation6 + $0x10] sm:$0xff]  ;;  %v335_v3 = vpack.c.bf16 %v63_v1, %v62_v0  ;;  %v65_v4 = vld [vmem:[#allocation6 + $0x18] sm:$0xff]  ;;  %v152_v7 = vld [vmem:[#allocation8] sm:$0xff]  ;;  %s250_s21 = sshll.u32 %s480_s2, 4  ;;  %s251_s21 = int_to_ptr.vmem [resolvable:$true] %s250_s21 }
  0x38   :  { %v60_v5 = vld [vmem:[#allocation3] sm:$0xff]  ;;  %v339_v6 = vpack.c.bf16 %v65_v4, %v64_v2  ;;  %v153_v8 = vld [vmem:[#allocation8 + $0x8] sm:$0xff]  ;;  %v155_v11 = vld [vmem:[#allocation8 + $0x18] sm:$0xff]  ;;  %s447_s22 = scalar_lea.vmem %s251_s21, 256  ;;  %p452_p11 = scmp.lt.s32.totalorder %s251_s21, %s251_s21 }
  0x39   :  { %297 = vmatprep.mubr.msk.f32.mxu0 %vm66_vm0, %v60_v5  ;;  %v154_v9 = vld [vmem:[#allocation8 + $0x10] sm:$0xff]  ;;  %336 = vmatprep.subr.bf16.mxu0 %v335_v3  ;;  %v343_v10 = vpack.c.bf16 %v153_v8, %v152_v7  ;;  %v156_v13 = vld [vmem:[#allocation8 + $0x20] sm:$0xff]  ;;  %v157_v14 = vld [vmem:[#allocation8 + $0x28] sm:$0xff]  ;;  %p448_p10 = scmp.ne.s32.totalorder %s251_s21, %s447_s22  ;;  %p453_p12 = scmp.lt.s32.totalorder %s447_s22, %s447_s22 }
  0x3a   :  { %338 = vmatpush3.bf16.msra.mxu0 %v335_v3  ;;  %v347_v12 = vpack.c.bf16 %v155_v11, %v154_v9  ;;  %v351_v15 = vpack.c.bf16 %v157_v14, %v156_v13  ;;  %v61_v16 = vld [vmem:[#allocation3 + $0x8] sm:$0xff]  ;;  %v158_v17 = vld [vmem:[#allocation8 + $0x30] sm:$0xff]  ;;  %v160_v20 = vld [vmem:[#allocation8 + $0x40] sm:$0xff] }
  0x3b   :  { %340 = vmatprep.subr.bf16.mxu0 %v339_v6  ;;  %344 = vmatprep.subr.bf16.mxu1 %v343_v10  ;;  %v159_v18 = vld [vmem:[#allocation8 + $0x38] sm:$0xff]  ;;  %v161_v21 = vld [vmem:[#allocation8 + $0x48] sm:$0xff]  ;;  %v162_v23 = vld [vmem:[#allocation8 + $0x50] sm:$0xff]  ;;  %p454_p13 = por %p453_p12, %p452_p11 }
  0x3c   :  { %346 = vmatpush3.bf16.msra.mxu1 %v343_v10  ;;  %v355_v19 = vpack.c.bf16 %v159_v18, %v158_v17  ;;  %v359_v22 = vpack.c.bf16 %v161_v21, %v160_v20  ;;  %v163_v24 = vld [vmem:[#allocation8 + $0x58] sm:$0xff]  ;;  %v164_v26 = vld [vmem:[#allocation8 + $0x60] sm:$0xff]  ;;  %v165_v27 = vld [vmem:[#allocation8 + $0x68] sm:$0xff] }
  0x3d   :  { %348 = vmatprep.subr.bf16.mxu1 %v347_v12  ;;  %v363_v25 = vpack.c.bf16 %v163_v24, %v162_v23  ;;  %v367_v28 = vpack.c.bf16 %v165_v27, %v164_v26  ;;  %v166_v29 = vld [vmem:[#allocation8 + $0x70] sm:$0xff]  ;;  %v167_v30 = vld [vmem:[#allocation8 + $0x78] sm:$0xff]  ;;  %p455_p0 = pnand %p454_p13, %p448_p10 }
  0x3e   :  { %342 = vmatpush3.bf16.msra.mxu0 %v339_v6  ;;  %v371_v31 = vpack.c.bf16 %v167_v30, %v166_v29 }
  0x40   :  { %350 = vmatpush3.bf16.msra.mxu1 %v347_v12 }
  0x41   :  { %298 = vmatmul.mubr.msk.f32.vlgmr.msra.gmra.mrb[0].mxu0 %vm66_vm0, %v61_v16  ;;  %352 = vmatprep.subr.bf16.mxu1 %v351_v15 }
  0x44   :  { %354 = vmatpush3.bf16.msra.mxu1 %v351_v15 }
  0x45   :  { %356 = vmatprep.subr.bf16.mxu1 %v355_v19 }
  0x48   :  { %358 = vmatpush3.bf16.msra.mxu1 %v355_v19 }
  0x49   :  { %360 = vmatprep.subr.bf16.mxu1 %v359_v22 }
  0x4c   :  { %362 = vmatpush3.bf16.msra.mxu1 %v359_v22 }
  0x4d   :  { %364 = vmatprep.subr.bf16.mxu1 %v363_v25 }
  0x50   :  { %366 = vmatpush3.bf16.msra.mxu1 %v363_v25 }
  0x51   :  { %368 = vmatprep.subr.bf16.mxu1 %v367_v28 }
  0x54   :  { %370 = vmatpush3.bf16.msra.mxu1 %v367_v28 }
  0x55   :  { %372 = vmatprep.subr.bf16.mxu1 %v371_v31 }
  0x58   :  { %374 = vmatpush3.bf16.msra.mxu1 %v371_v31 }
 0x114   :  { %v299_v32 = vpop.f32.mrb[0].mxu0 }
 0x115   :  { %v139_v33 = vpop.f32.mrb[1].mxu0 }
 0x116   :  { %332 = vmatprep.mubr.f32.mxu1 %v139_v33 }
 0x117   :  { %333 = vmatmul.mubr.f32.vlgmr.msra.gmra.mrb[0].mxu1 %v299_v32 }
 0x1ea   :  { %v334_v34 = vpop.f32.mrb[0].mxu1 }
 0x1eb   :  { %244 = vst [vmem:[#allocation9 + $0x8] sm:$0xff] %v334_v34  ;;  %v234_v35 = vpop.f32.mrb[1].mxu1 }
 0x1ec   :  { %243 = vst [vmem:[#allocation9] sm:$0xff] %v234_v35 }
 0x1ed   :  { %458 = shalt.err (!%p455_p0)
}
 0x1ee   :  { %s459_s27 = scalar_lea.hbm %s573_s3, 256 }
 0x1ef   :  { %p460_p1 = scmp.ne.s32.totalorder %s573_s3, %s459_s27  ;;  %p463_p2 = scmp.lt.u32.totalorder %s459_s27, %s573_s3 }
 0x1f1   :  { %p465_p3 = pnand %p463_p2, %p460_p1 }
 0x1f3   :  { %468 = shalt.err (!%p465_p3)
}
 0x1f4   :  { %256 = dma.vmem_to_hbm [thread:$0]  %s251_s21, 256, %s573_s3, [#allocation5], %s477_s24, %s477_s24, %s478_s25  }
 0x1f5   :  { %473 = dma.done.wait [#allocation5], 256  }
 0x1f6   :  { %474 = vsyncadd [#allocation5], 4294967040 }
 0x1f7   :  { %260 = vsyncpa [#allocation4], 1 }
 0x1f8   :  { %261 = vsyncpa [#allocation7], 1 }
 0x1f9   :  { %262 = vsyncpa [#allocation5], 1 }

</bundles_post_ra>
